<compile_context>
chip_gen: v7x
topology: tpu7x:2x2x1
jax: 0.10.0
libtpu: 0.0.40
codegen_flags: <defaults>
</compile_context>

<pallas_src>
import functools

import jax
import jax.numpy as jnp
from jax import lax
from jax.experimental import pallas as pl
from jax.experimental.pallas import tpu as pltpu

LOG_STD_MIN = -20.0
LOG_STD_MAX = 2.0
N_HEAD = 4            # fused heads: [ mu(2) | log_sigma(2) ]
MAX_BATCH_TILE = 512  # rows per grid step when the batch is large


def _round8(n):
    return ((n + 7) // 8) * 8


def actor_kernel(x_ref, w_ref, b_ref, out_ref, *, d_in, fc1, fc2, o1, o2, o3):
    x = x_ref[...]

    # Static views into the packed slabs (all row offsets are multiples of 8).
    w1 = w_ref[o1:o1 + d_in, 0:fc1]
    w2 = w_ref[o2:o2 + fc1, 0:fc2]
    wh = w_ref[o3:o3 + fc2, 0:N_HEAD]
    b1 = b_ref[0:1, 0:fc1]
    b2 = b_ref[1:2, 0:fc2]
    bh = b_ref[2:3, 0:N_HEAD]

    h1 = jnp.maximum(jnp.dot(x, w1, preferred_element_type=jnp.float32) + b1, 0.0)
    h2 = jnp.maximum(jnp.dot(h1, w2, preferred_element_type=jnp.float32) + b2, 0.0)
    heads = jnp.dot(h2, wh, preferred_element_type=jnp.float32) + bh

    # Columns 0:2 = mu (identity), columns 2:4 = log_sigma (clamped).
    col = lax.broadcasted_iota(jnp.int32, heads.shape, 1)
    clamped = jnp.clip(heads, LOG_STD_MIN, LOG_STD_MAX)
    out_ref[...] = jnp.where(col < 2, heads, clamped).astype(out_ref.dtype)
    # TODO(synk): sample_normal (exp, reparameterized sample via pltpu.prng_*,
    # sigmoid/tanh squash, log-prob correction) could be fused here too, but
    # forward() only returns (mu, sigma), so it is left to the caller.


def init_params(key, input_dim, fc1_dims, fc2_dims):
    """Deterministic init mimicking PyTorch nn.Linear (uniform +/- 1/sqrt(fan_in))."""
    def linear(k, fan_in, fan_out):
        kw, kb = jax.random.split(k)
        bound = 1.0 / jnp.sqrt(fan_in)
        w = jax.random.uniform(kw, (fan_in, fan_out), jnp.float32, -bound, bound)
        b = jax.random.uniform(kb, (1, fan_out), jnp.float32, -bound, bound)
        return w, b

    k1, k2, k3, k4 = jax.random.split(key, 4)
    w1, b1 = linear(k1, input_dim, fc1_dims)
    w2, b2 = linear(k2, fc1_dims, fc2_dims)
    wmu, bmu = linear(k3, fc2_dims, 2)
    wsg, bsg = linear(k4, fc2_dims, 2)
    return (w1, b1, w2, b2, wmu, bmu, wsg, bsg)


def pack_params(params, d_in, fc1, fc2):
    """Pack the 4 Linear layers into one weight slab + one bias slab.

    Weight slab rows: [W1 | W2 | W_mu,W_sigma] (each segment 8-row aligned),
    lane width = max(fc1, fc2, 4).  Bias slab rows 0/1/2 = b1 / b2 / b_heads.
    """
    w1, b1, w2, b2, wmu, bmu, wsg, bsg = params
    wh = jnp.concatenate([wmu, wsg], axis=1)   # [fc2, 4]
    bh = jnp.concatenate([bmu, bsg], axis=1)   # [1, 4]

    width = max(fc1, fc2, N_HEAD)
    o1 = 0
    o2 = _round8(d_in)
    o3 = o2 + _round8(fc1)
    rows = o3 + _round8(fc2)

    w_pack = jnp.zeros((rows, width), jnp.float32)
    w_pack = w_pack.at[o1:o1 + d_in, :fc1].set(w1)
    w_pack = w_pack.at[o2:o2 + fc1, :fc2].set(w2)
    w_pack = w_pack.at[o3:o3 + fc2, :N_HEAD].set(wh)

    b_pack = jnp.zeros((8, width), jnp.float32)
    b_pack = b_pack.at[0, :fc1].set(b1[0])
    b_pack = b_pack.at[1, :fc2].set(b2[0])
    b_pack = b_pack.at[2, :N_HEAD].set(bh[0])

    return w_pack, b_pack, (o1, o2, o3)


def actor_forward(state, packed, dims):
    """state: [B, input_dim] f32.  Returns (mu [B,2], sigma [B,2])."""
    d_in, fc1, fc2 = dims
    w_pack, b_pack, (o1, o2, o3) = packed
    B = state.shape[0]

    # One batch tile if it fits; otherwise tile the batch so grid steps shard
    # across TensorCores (v7x) while the weight slabs stay resident in VMEM.
    tile_b = B if B <= MAX_BATCH_TILE else MAX_BATCH_TILE
    pad = (-B) % tile_b
    x = jnp.pad(state, ((0, pad), (0, 0))) if pad else state
    Bp = B + pad
    grid = (Bp // tile_b,)

    kernel = functools.partial(actor_kernel, d_in=d_in, fc1=fc1, fc2=fc2,
                               o1=o1, o2=o2, o3=o3)

    cost = pl.CostEstimate(
        flops=2 * Bp * (d_in * fc1 + fc1 * fc2 + fc2 * N_HEAD),
        transcendentals=0,
        bytes_accessed=4 * (x.size + w_pack.size + b_pack.size + Bp * N_HEAD),
    )

    out = pl.pallas_call(
        kernel,
        out_shape=jax.ShapeDtypeStruct((Bp, N_HEAD), jnp.float32),
        grid=grid,
        in_specs=[
            pl.BlockSpec((tile_b, d_in), lambda i: (i, 0)),
            # Constant block index -> slabs are DMA'd once and stay resident.
            pl.BlockSpec(w_pack.shape, lambda i: (0, 0)),
            pl.BlockSpec(b_pack.shape, lambda i: (0, 0)),
        ],
        out_specs=pl.BlockSpec((tile_b, N_HEAD), lambda i: (i, 0)),
        compiler_params=pltpu.CompilerParams(
            dimension_semantics=("parallel",)),
        cost_estimate=cost,
    )(x, w_pack, b_pack)

    out = out[:B]
    return out[:, 0:2], out[:, 2:4]


def actor_forward_ref(state, params):
    w1, b1, w2, b2, wmu, bmu, wsg, bsg = params
    h1 = jnp.maximum(state @ w1 + b1, 0.0)
    h2 = jnp.maximum(h1 @ w2 + b2, 0.0)
    mu = h2 @ wmu + bmu
    sigma = jnp.clip(h2 @ wsg + bsg, LOG_STD_MIN, LOG_STD_MAX)
    return mu, sigma


if __name__ == "__main__":
    key = jax.random.PRNGKey(0)
    kp, kx = jax.random.split(key)

    # Small shapes consistent with the module: input_dims=(16,), fc1=64, fc2=32, batch=8
    B, d_in, fc1, fc2 = 8, 16, 64, 32

    params = init_params(kp, d_in, fc1, fc2)
    packed = pack_params(params, d_in, fc1, fc2)
    state = jax.random.normal(kx, (B, d_in), jnp.float32)

    mu, sigma = actor_forward(state, packed, (d_in, fc1, fc2))
    jax.block_until_ready((mu, sigma))

    mu_ref, sigma_ref = actor_forward_ref(state, params)
    assert jnp.allclose(mu, mu_ref, atol=1e-4), "mu mismatch"
    assert jnp.allclose(sigma, sigma_ref, atol=1e-4), "sigma mismatch"

    print("KERNEL_OK")
</pallas_src>

<mosaic_0001>
module attributes {stable_mosaic.version = 11 : i64} {
  func.func @actor_kernel(%arg0: i32, %arg1: memref<8x16xf32, #tpu.memory_space<vmem>>, %arg2: memref<112x64xf32, #tpu.memory_space<vmem>>, %arg3: memref<8x64xf32, #tpu.memory_space<vmem>>, %arg4: memref<8x4xf32, #tpu.memory_space<vmem>>) attributes {dimension_semantics = [#tpu.dimension_semantics<parallel>], iteration_bounds = array<i64: 1>, scalar_prefetch = 0 : i64, scratch_operands = 0 : i64, tpu.core_type = #tpu.core_type<tc>, window_params = [{transform_indices = @transform_0, window_bounds = array<i64: 8, 16>}, {pipeline_mode = #tpu.pipeline_mode<synchronous>, transform_indices = @transform_1, window_bounds = array<i64: 112, 64>}, {pipeline_mode = #tpu.pipeline_mode<synchronous>, transform_indices = @transform_2, window_bounds = array<i64: 8, 64>}, {transform_indices = @transform_3, window_bounds = array<i64: 8, 4>}]} {
    %c0 = arith.constant 0 : index
    %c0_0 = arith.constant 0 : index
    %0 = vector.load %arg1[%c0, %c0_0] : memref<8x16xf32, #tpu.memory_space<vmem>>, vector<8x16xf32>
    %c0_1 = arith.constant 0 : index
    %c0_2 = arith.constant 0 : index
    %1 = vector.load %arg2[%c0_1, %c0_2] : memref<112x64xf32, #tpu.memory_space<vmem>>, vector<16x64xf32>
    %c16 = arith.constant 16 : index
    %c0_3 = arith.constant 0 : index
    %2 = vector.load %arg2[%c16, %c0_3] : memref<112x64xf32, #tpu.memory_space<vmem>>, vector<64x32xf32>
    %c80 = arith.constant 80 : index
    %c0_4 = arith.constant 0 : index
    %3 = vector.load %arg2[%c80, %c0_4] : memref<112x64xf32, #tpu.memory_space<vmem>>, vector<32x4xf32>
    %c0_5 = arith.constant 0 : index
    %c0_6 = arith.constant 0 : index
    %4 = vector.load %arg3[%c0_5, %c0_6] : memref<8x64xf32, #tpu.memory_space<vmem>>, vector<1x64xf32>
    %c1 = arith.constant 1 : index
    %c0_7 = arith.constant 0 : index
    %5 = vector.load %arg3[%c1, %c0_7] : memref<8x64xf32, #tpu.memory_space<vmem>>, vector<1x32xf32>
    %c2 = arith.constant 2 : index
    %c0_8 = arith.constant 0 : index
    %6 = vector.load %arg3[%c2, %c0_8] : memref<8x64xf32, #tpu.memory_space<vmem>>, vector<1x4xf32>
    %cst = arith.constant dense<0.000000e+00> : vector<8x64xf32>
    %7 = tpu.matmul %0, %1, %cst {dimension_numbers = #tpu.dot_dimension_numbers<[1], [0], [0], [1], [0, 0, 1, 1], [], []>} : vector<8x16xf32>, vector<16x64xf32>, vector<8x64xf32> -> vector<8x64xf32>
    %8 = vector.broadcast %4 : vector<1x64xf32> to vector<8x64xf32>
    %9 = arith.addf %7, %8 : vector<8x64xf32>
    %cst_9 = arith.constant 0.000000e+00 : f32
    %10 = vector.broadcast %cst_9 : f32 to vector<8x64xf32>
    %11 = arith.maximumf %9, %10 : vector<8x64xf32>
    %cst_10 = arith.constant dense<0.000000e+00> : vector<8x32xf32>
    %12 = tpu.matmul %11, %2, %cst_10 {dimension_numbers = #tpu.dot_dimension_numbers<[1], [0], [0], [1], [0, 0, 1, 1], [], []>} : vector<8x64xf32>, vector<64x32xf32>, vector<8x32xf32> -> vector<8x32xf32>
    %13 = vector.broadcast %5 : vector<1x32xf32> to vector<8x32xf32>
    %14 = arith.addf %12, %13 : vector<8x32xf32>
    %cst_11 = arith.constant 0.000000e+00 : f32
    %15 = vector.broadcast %cst_11 : f32 to vector<8x32xf32>
    %16 = arith.maximumf %14, %15 : vector<8x32xf32>
    %cst_12 = arith.constant dense<0.000000e+00> : vector<8x4xf32>
    %17 = tpu.matmul %16, %3, %cst_12 {dimension_numbers = #tpu.dot_dimension_numbers<[1], [0], [0], [1], [0, 0, 1, 1], [], []>} : vector<8x32xf32>, vector<32x4xf32>, vector<8x4xf32> -> vector<8x4xf32>
    %18 = vector.broadcast %6 : vector<1x4xf32> to vector<8x4xf32>
    %19 = arith.addf %17, %18 : vector<8x4xf32>
    %20 = tpu.iota {dimensions = array<i32: 1>} : vector<8x4xi32>
    %cst_13 = arith.constant -2.000000e+01 : f32
    %cst_14 = arith.constant 2.000000e+00 : f32
    %21 = vector.broadcast %cst_13 : f32 to vector<8x4xf32>
    %22 = arith.maximumf %21, %19 : vector<8x4xf32>
    %23 = vector.broadcast %cst_14 : f32 to vector<8x4xf32>
    %24 = arith.minimumf %23, %22 : vector<8x4xf32>
    %c2_i32 = arith.constant 2 : i32
    %25 = vector.broadcast %c2_i32 : i32 to vector<8x4xi32>
    %26 = arith.cmpi slt, %20, %25 : vector<8x4xi32>
    %27 = arith.select %26, %19, %24 : vector<8x4xi1>, vector<8x4xf32>
    %c0_15 = arith.constant 0 : index
    %c0_16 = arith.constant 0 : index
    %28 = vector.load %arg4[%c0_15, %c0_16] : memref<8x4xf32, #tpu.memory_space<vmem>>, vector<8x4xf32>
    tpu.vector_store %arg4[%c0_15, %c0_16], %27 {strides = array<i32>} : memref<8x4xf32, #tpu.memory_space<vmem>>, vector<8x4xf32>,
    return
  }
  func.func @transform_0(%arg0: i32) -> (i32, i32) {
    %c0_i32 = arith.constant 0 : i32
    %c0_i32_0 = arith.constant 0 : i32
    return %arg0, %c0_i32 : i32, i32
  }
  func.func @transform_1(%arg0: i32) -> (i32, i32) {
    %c0_i32 = arith.constant 0 : i32
    %c0_i32_0 = arith.constant 0 : i32
    %c0_i32_1 = arith.constant 0 : i32
    return %c0_i32, %c0_i32_0 : i32, i32
  }
  func.func @transform_2(%arg0: i32) -> (i32, i32) {
    %c0_i32 = arith.constant 0 : i32
    %c0_i32_0 = arith.constant 0 : i32
    %c0_i32_1 = arith.constant 0 : i32
    return %c0_i32, %c0_i32_0 : i32, i32
  }
  func.func @transform_3(%arg0: i32) -> (i32, i32) {
    %c0_i32 = arith.constant 0 : i32
    %c0_i32_0 = arith.constant 0 : i32
    return %arg0, %c0_i32 : i32, i32
  }
}

</mosaic_0001>

<bundles_post_ra>
// kernel: tpu_custom_call.1
= control target key start
LH: loop header
LB: loop body
LE: loop exit
PB: predicated region body
PF: predicated region fallthrough
CT: control target
= control target key end

     0   :  { %v364_v0 = vmov 0.0|0.0   ;;  %vm365_vm0 = vmmov 0   ;;  %v366_v3 = vmov 0.0   ;;  %vm36_vm1 = vcmask 130048   ;;  %s447_s1 = inlined_call_operand.vmem [shape: f32[112,64], index: 1, kind: input, shape index: {}]   ;;  %s448_s0 = inlined_call_operand.vmem [shape: f32[8,16], index: 0, kind: input, shape index: {}]   ;;  %s449_s2 = inlined_call_operand.vmem [shape: f32[8,64], index: 2, kind: input, shape index: {}]   ;;  %s450_s3 = inlined_call_operand.vmem [shape: f32[8,4], index: 3, kind: output, shape index: {}]  }
   0x1   :  { %340 = vmatprep.subr.bf16.mxu0 %v364_v0  ;;  %v15_v1 = vld [vmem:[%s447_s1] sm:$0xff]  ;;  %v16_v2 = vld [vmem:[%s447_s1 + $0x8] sm:$0xff]  ;;  %307 = vmatprep.mubr.msk.f32.mxu0 %vm365_vm0, %v366_v3  ;;  %v17_v5 = vld [vmem:[%s447_s1 + $0x10] sm:$0xff]  ;;  %vm115_vm2 = vcmask 523264   ;;  %vm194_vm3 = vcmask 261120   ;;  %v268_v34 = vlaneseq  ;;  %vm274_vm5 = vcmask 31744  }
   0x2   :  { %v341_v4 = vpack.c.bf16 %v16_v2, %v15_v1  ;;  %343 = vmatprep.subr.bf16.mxu1 %v364_v0  ;;  %v18_v6 = vld [vmem:[%s447_s1 + $0x18] sm:$0xff]  ;;  %v19_v7 = vld [vmem:[%s447_s1 + $0x20] sm:$0xff]  ;;  %326 = vmatprep.mubr.msk.f32.mxu1 %vm365_vm0, %v366_v3  ;;  %v20_v9 = vld [vmem:[%s447_s1 + $0x28] sm:$0xff] }
   0x3   :  { %v344_v8 = vpack.c.bf16 %v18_v6, %v17_v5  ;;  %v14_v10 = vld [vmem:[%s448_s0] sm:$0xff]  ;;  %v347_v11 = vpack.c.bf16 %v20_v9, %v19_v7  ;;  %v21_v12 = vld [vmem:[%s447_s1 + $0x30] sm:$0xff]  ;;  %v22_v13 = vld [vmem:[%s447_s1 + $0x38] sm:$0xff]  ;;  %v269_v37 = vand.u32 127, %v268_v34 }
   0x4   :  { %342 = vmatpush3.bf16.msra.mxu0 %v341_v4  ;;  %v350_v14 = vpack.c.bf16 %v22_v13, %v21_v12  ;;  %v23_v15 = vld [vmem:[%s447_s1 + $0x40] sm:$0xff]  ;;  %v24_v16 = vld [vmem:[%s447_s1 + $0x48] sm:$0xff]  ;;  %v25_v18 = vld [vmem:[%s447_s1 + $0x50] sm:$0xff] }
   0x5   :  { %345 = vmatpush3.bf16.msra.mxu1 %v344_v8  ;;  %355 = vmatprep.subr.bf16.mxu0 %v364_v0  ;;  %v353_v17 = vpack.c.bf16 %v24_v16, %v23_v15  ;;  %v26_v19 = vld [vmem:[%s447_s1 + $0x58] sm:$0xff]  ;;  %v280_v21 = vld [vmem:[%s449_s2] ss:$0 sm:$0xff]  ;;  %v28_v27 = vld [vmem:[%s447_s1 + $0x68] sm:$0xff]  ;;  %vm272_vm4 = vcmp.lt.s32.totalorder %v269_v37, 2 }
   0x6   :  { %346 = vmatprep.subr.bf16.mxu1 %v364_v0  ;;  %v356_v20 = vpack.c.bf16 %v26_v19, %v25_v18  ;;  %v27_v26 = vld [vmem:[%s447_s1 + $0x60] sm:$0xff] }
   0x7   :  { %308 = vmatmul.mubr.msk.f32.vlgmr.msra.gmra.mrb[0].mxu0 %vm36_vm1, %v14_v10  ;;  %v359_v28 = vpack.c.bf16 %v28_v27, %v27_v26  ;;  %v282_v29 = vld [vmem:[%s449_s2 + $0x1] ss:$0 sm:$0xff]  ;;  %v284_v35 = vld [vmem:[%s449_s2 + $0x2] ss:$0 sm:$0xff] }
   0x8   :  { %337 = vmatprep.mubr.msk.f32.mxu0 %vm365_vm0, %v366_v3  ;;  %357 = vmatpush3.bf16.msra.mxu0 %v356_v20 }
   0x9   :  { %348 = vmatpush3.bf16.msra.mxu1 %v347_v11  ;;  %358 = vmatprep.subr.bf16.mxu0 %v364_v0 }
   0xa   :  { %349 = vmatprep.subr.bf16.mxu1 %v364_v0 }
   0xc   :  { %360 = vmatpush3.bf16.msra.mxu0 %v359_v28 }
   0xd   :  { %351 = vmatpush3.bf16.msra.mxu1 %v350_v14 }
   0xe   :  { %352 = vmatprep.subr.bf16.mxu1 %v364_v0 }
  0x11   :  { %354 = vmatpush3.bf16.msra.mxu1 %v353_v17 }
  0xda   :  { %v106_v22 = vpop.f32.mrb[0].mxu0 }
  0xdb   :  { %v107_v23 = vadd.f32 %v280_v21, %v106_v22  ;;  %v309_v24 = vpop.f32.mrb[1].mxu0 }
  0xdd   :  { %v110_v25 = vmax.f32 %v107_v23, 0.0 }
  0xdf   :  { %327 = vmatmul.mubr.msk.f32.vlgmr.msra.gmra.mrb[0].mxu1 %vm115_vm2, %v110_v25 }
 0x1b2   :  { %v185_v30 = vpop.f32.mrb[0].mxu1 }
 0x1b3   :  { %v186_v31 = vadd.f32 %v282_v29, %v185_v30  ;;  %v328_v32 = vpop.f32.mrb[1].mxu1 }
 0x1b5   :  { %v189_v33 = vmax.f32 %v186_v31, 0.0 }
 0x1b7   :  { %338 = vmatmul.mubr.msk.f32.vlgmr.msra.gmra.mrb[2].mxu0 %vm194_vm3, %v189_v33 }
 0x28a   :  { %v264_v36 = vpop.f32.mrb[2].mxu0 }
 0x28b   :  { %v265_v38 = vadd.f32 %v284_v35, %v264_v36  ;;  %v339_v39 = vpop.f32.mrb[3].mxu0 }
 0x28d   :  { %v270_v40 = vmax.f32 %v265_v38, -20.0 }
 0x28f   :  { %v271_v41 = vmin.f32 %v270_v40, 2.0 }
 0x291   :  { %v273_v42 = vsel %vm272_vm4, %v265_v38, %v271_v41 }
 0x292   :  { %275 = vst.msk [vmem:[%s450_s3] sm:$0xff] %vm274_vm5, %v273_v42 }

</bundles_post_ra>
